<compile_context>
chip_gen: v6e
topology: v6e:2x2x1
jax: 0.10.0
libtpu: 0.0.40
codegen_flags: <defaults>
</compile_context>

<pallas_src>
import jax
import jax.numpy as jnp
from jax.experimental import pallas as pl
from jax.experimental.pallas import tpu as pltpu

# ----- module hyper-parameters (small, consistent with the reference module) -----
IN_DIM = 32                    # in_dim  (the block requires in_dim == 2 * res_dim)
DIFF_DIM = 32                  # diff_dim
COND_DIM = 16                  # cond_dim
RES_DIM = 16                   # res_dim
NUM_HEADS = 2
DIM_HEAD = 64
INNER = NUM_HEADS * DIM_HEAD   # 128
ATTN_SCALE = DIM_HEAD ** (-0.5)
LN_EPS = 1e-5
LEAKY_SLOPE = 0.4

# Packed weight-slab row offsets (all multiples of 16 -> clean bf16 sublane tiles)
_W_ROWS = 192
_CP_R0, _CP_R1 = 0, 16         # condproj W            (16, 32)  in cols [0:32)
_CV_R0, _CV_R1 = 16, 48        # crossattn.to_v W      (32, 128)
_CO_R0, _CO_R1 = 48, 176       # crossattn.to_out W    (128, 32) in cols [0:32)
_OP_R0, _OP_R1 = 176, 192      # outproj W             (16, 64)  in cols [0:64)


def _round_up(n, m):
    return ((n + m - 1) // m) * m


# ---------------------------- the fused kernel ----------------------------
def _residual_block_kernel(x_ref, cond_ref, w_ref, b_ref, o_ref):
    x = x_ref[...]                                     # (TB, IN_DIM)   f32
    conds = cond_ref[...]                              # (TB, COND_DIM) f32

    # Static slices into the packed parameter slabs (compile-time offsets; free).
    w_cp = w_ref[_CP_R0:_CP_R1, 0:IN_DIM]              # condproj          (16, 32)  bf16
    w_cv = w_ref[_CV_R0:_CV_R1, :]                     # crossattn.to_v    (32, 128) bf16
    w_og = w_ref[_CO_R0:_CO_R1, 0:RES_DIM]             # to_out -> gate    (128, 16) bf16
    w_of = w_ref[_CO_R0:_CO_R1, RES_DIM:IN_DIM]        # to_out -> filt    (128, 16) bf16
    w_oo = w_ref[_OP_R0:_OP_R1, 0:IN_DIM]              # outproj -> out    (16, 32)  bf16
    w_os = w_ref[_OP_R0:_OP_R1, IN_DIM:2 * IN_DIM]     # outproj -> skip   (16, 32)  bf16

    b_cp = b_ref[0:1, 0:IN_DIM]                        # (1, 32) f32
    b_og = b_ref[1:2, 0:RES_DIM]
    b_of = b_ref[1:2, RES_DIM:IN_DIM]
    b_oo = b_ref[2:3, 0:IN_DIM]
    b_os = b_ref[2:3, IN_DIM:2 * IN_DIM]

    def mm(a, w):  # bf16 operands on the MXU, f32 accumulation
        return jnp.dot(a.astype(jnp.bfloat16), w, preferred_element_type=jnp.float32)

    def leaky(t):
        return jnp.where(t >= 0, t, LEAKY_SLOPE * t)

    # cond = condproj(conds)
    cond_p = mm(conds, w_cp) + b_cp                    # (TB, 32)

    # CrossAttention with one query/key position: softmax over a single key is
    # exactly 1 -> attention output == to_v(cond).  q/k/scale/softmax are dead,
    # as is the query source (diffproj + SelfAttention + LayerNorm).
    v = mm(cond_p, w_cv)                               # (TB, 128)
    gate = mm(v, w_og) + b_og                          # to_out cols [0:16)
    filt = mm(v, w_of) + b_of                          # to_out cols [16:32)
    g = jnp.tanh(gate) * jax.nn.sigmoid(filt)          # gated activation (TB, 16)

    out_h = leaky(mm(g, w_oo) + b_oo)                  # outproj cols [0:32)
    skip = leaky(mm(g, w_os) + b_os)                   # outproj cols [32:64)

    # out = (res + out) / sqrt(2); store as one lane-dense [out | skip] slab.
    o_ref[:, 0:IN_DIM] = (x + out_h) * jnp.float32(0.7071067811865476)
    o_ref[:, IN_DIM:2 * IN_DIM] = skip


# ---------------------------- wrapper / packing ----------------------------
def pack_params(p):
    """Pack the live parameters: one bf16 weight slab + one f32 bias slab."""
    w = jnp.zeros((_W_ROWS, 128), jnp.float32)
    w = w.at[_CP_R0:_CP_R1, 0:IN_DIM].set(p["cp_w"])
    w = w.at[_CV_R0:_CV_R1, :].set(p["ca_v_w"])
    w = w.at[_CO_R0:_CO_R1, 0:IN_DIM].set(p["ca_out_w"])
    w = w.at[_OP_R0:_OP_R1, 0:2 * IN_DIM].set(p["op_w"])
    b = jnp.zeros((8, 128), jnp.float32)
    b = b.at[0, 0:IN_DIM].set(p["cp_b"])
    b = b.at[1, 0:IN_DIM].set(p["ca_out_b"])
    b = b.at[2, 0:2 * IN_DIM].set(p["op_b"])
    return w.astype(jnp.bfloat16), b


def residual_block_forward(x, conds, diff_emb, w_slab, b_slab, *, tile_b=256):
    """Pallas forward of ResidualBlock.forward(x, conds, diff_emb) -> (out, skip)."""
    # diff_emb only feeds diffproj -> SelfAttention -> LayerNorm, whose sole
    # consumer is the (dead) cross-attention query, so it never reaches the
    # output for sequence length 1.  Kept for signature parity with the module.
    del diff_emb

    B = x.shape[0]
    tb = min(tile_b, _round_up(max(B, 1), 8))          # batch tile, multiple of 8
    Bp = _round_up(B, tb)
    x = jnp.pad(x.astype(jnp.float32), ((0, Bp - B), (0, 0)))
    conds = jnp.pad(conds.astype(jnp.float32), ((0, Bp - B), (0, 0)))

    out = pl.pallas_call(
        _residual_block_kernel,
        out_shape=jax.ShapeDtypeStruct((Bp, 2 * IN_DIM), jnp.float32),
        grid=(Bp // tb,),
        in_specs=[
            pl.BlockSpec((tb, IN_DIM), lambda i: (i, 0)),
            pl.BlockSpec((tb, COND_DIM), lambda i: (i, 0)),
            pl.BlockSpec(w_slab.shape, lambda i: (0, 0)),   # weights stay resident
            pl.BlockSpec(b_slab.shape, lambda i: (0, 0)),
        ],
        out_specs=pl.BlockSpec((tb, 2 * IN_DIM), lambda i: (i, 0)),
        compiler_params=pltpu.CompilerParams(
            dimension_semantics=("parallel",),              # batch tiles across TCs (v7x)
            vmem_limit_bytes=32 * 1024 * 1024,              # safe on v5e/v6e/v7x
        ),
    )(x, conds, w_slab, b_slab)

    return out[:B, 0:IN_DIM], out[:B, IN_DIM:2 * IN_DIM]


# ---------------------------- pure-JAX reference ----------------------------
def _mha_seq1(q, k, v):
    """Literal multi-head attention math for sequence length 1."""
    B = q.shape[0]
    qh = q.reshape(B, NUM_HEADS, DIM_HEAD) * ATTN_SCALE
    kh = k.reshape(B, NUM_HEADS, DIM_HEAD)
    vh = v.reshape(B, NUM_HEADS, DIM_HEAD)
    sim = jnp.sum(qh * kh, axis=-1, keepdims=True)     # (B, H, 1): i = j = 1
    attn = jax.nn.softmax(sim, axis=-1)                # softmax over a single key
    return (attn * vh).reshape(B, INNER)


def reference_forward(x, conds, diff_emb, p):
    """Transcription of ResidualBlock.forward with ALL paths (no pruning)."""
    res = x
    h = x + (diff_emb @ p["dp_w"] + p["dp_b"])                       # diffproj
    qkv = h @ p["sa_qkv_w"]                                          # Conv1d(k=1), seq=1
    q, k, v = jnp.split(qkv, 3, axis=-1)
    h = _mha_seq1(q, k, v) @ p["sa_out_w"] + p["sa_out_b"]           # selfattention
    mu = jnp.mean(h, axis=-1, keepdims=True)                         # norm1
    var = jnp.mean((h - mu) ** 2, axis=-1, keepdims=True)
    h = (h - mu) / jnp.sqrt(var + LN_EPS) * p["ln_g"] + p["ln_b"]
    cond = conds @ p["cp_w"] + p["cp_b"]                             # condproj
    ca = _mha_seq1(h @ p["ca_q_w"], cond @ p["ca_k_w"], cond @ p["ca_v_w"])
    h = ca @ p["ca_out_w"] + p["ca_out_b"]                           # condattention
    gate, filt = jnp.split(h, 2, axis=-1)
    z = jnp.tanh(gate) * jax.nn.sigmoid(filt)
    z = z @ p["op_w"] + p["op_b"]                                    # outproj
    z = jnp.where(z >= 0, z, LEAKY_SLOPE * z)
    out, skip = jnp.split(z, 2, axis=-1)
    return (res + out) / jnp.sqrt(jnp.float32(2.0)), skip


def init_params(key):
    """Deterministic synthetic parameters; weights stored as (in, out)."""
    ks = iter(jax.random.split(key, 14))

    def w(fi, fo):
        return (0.05 * jax.random.normal(next(ks), (fi, fo))).astype(jnp.float32)

    def b(fo):
        return (0.05 * jax.random.normal(next(ks), (fo,))).astype(jnp.float32)

    return dict(
        dp_w=w(DIFF_DIM, 2 * RES_DIM), dp_b=b(2 * RES_DIM),          # diffproj      (dead)
        cp_w=w(COND_DIM, 2 * RES_DIM), cp_b=b(2 * RES_DIM),          # condproj
        sa_qkv_w=w(IN_DIM, 3 * INNER),                               # selfattn.to_qkv (dead)
        sa_out_w=w(INNER, IN_DIM), sa_out_b=b(IN_DIM),               # selfattn.to_out (dead)
        ln_g=jnp.ones((IN_DIM,), jnp.float32),                       # norm1 gamma    (dead)
        ln_b=jnp.zeros((IN_DIM,), jnp.float32),                      # norm1 beta     (dead)
        ca_q_w=w(IN_DIM, INNER),                                     # crossattn.to_q (dead)
        ca_k_w=w(2 * RES_DIM, INNER),                                # crossattn.to_k (dead)
        ca_v_w=w(2 * RES_DIM, INNER),                                # crossattn.to_v
        ca_out_w=w(INNER, IN_DIM), ca_out_b=b(IN_DIM),               # crossattn.to_out
        op_w=w(RES_DIM, 2 * IN_DIM), op_b=b(2 * IN_DIM),             # outproj
    )


if __name__ == "__main__":
    key = jax.random.PRNGKey(0)
    kx, kc, kd, kp = jax.random.split(key, 4)

    B = 4
    x = jax.random.normal(kx, (B, IN_DIM), dtype=jnp.float32)
    conds = jax.random.normal(kc, (B, COND_DIM), dtype=jnp.float32)
    diff_emb = jax.random.normal(kd, (B, DIFF_DIM), dtype=jnp.float32)

    params = init_params(kp)
    w_slab, b_slab = pack_params(params)

    out, skip = residual_block_forward(x, conds, diff_emb, w_slab, b_slab)
    out, skip = jax.block_until_ready((out, skip))
    assert out.shape == (B, IN_DIM) and skip.shape == (B, IN_DIM)
    assert out.dtype == jnp.float32 and skip.dtype == jnp.float32

    # Validate the pruned kernel against the full (softmax included) reference.
    ref_out, ref_skip = reference_forward(x, conds, diff_emb, params)
    err = max(float(jnp.max(jnp.abs(out - ref_out))),
              float(jnp.max(jnp.abs(skip - ref_skip))))
    assert err < 2e-2, f"mismatch vs pure-JAX reference: max abs err = {err}"

    print("KERNEL_OK")
</pallas_src>

<mosaic_0001>
module attributes {stable_mosaic.version = 11 : i64} {
  func.func @_residual_block_kernel(%arg0: i32, %arg1: memref<8x32xf32, #tpu.memory_space<vmem>>, %arg2: memref<8x16xf32, #tpu.memory_space<vmem>>, %arg3: memref<192x128xbf16, #tpu.memory_space<vmem>>, %arg4: memref<8x128xf32, #tpu.memory_space<vmem>>, %arg5: memref<8x64xf32, #tpu.memory_space<vmem>>) attributes {dimension_semantics = [#tpu.dimension_semantics<parallel>], iteration_bounds = array<i64: 1>, scalar_prefetch = 0 : i64, scratch_operands = 0 : i64, tpu.core_type = #tpu.core_type<tc>, window_params = [{transform_indices = @transform_0, window_bounds = array<i64: 8, 32>}, {transform_indices = @transform_1, window_bounds = array<i64: 8, 16>}, {pipeline_mode = #tpu.pipeline_mode<synchronous>, transform_indices = @transform_2, window_bounds = array<i64: 192, 128>}, {pipeline_mode = #tpu.pipeline_mode<synchronous>, transform_indices = @transform_3, window_bounds = array<i64: 8, 128>}, {transform_indices = @transform_4, window_bounds = array<i64: 8, 64>}]} {
    %c0 = arith.constant 0 : index
    %c0_0 = arith.constant 0 : index
    %0 = vector.load %arg1[%c0, %c0_0] : memref<8x32xf32, #tpu.memory_space<vmem>>, vector<8x32xf32>
    %c0_1 = arith.constant 0 : index
    %c0_2 = arith.constant 0 : index
    %1 = vector.load %arg2[%c0_1, %c0_2] : memref<8x16xf32, #tpu.memory_space<vmem>>, vector<8x16xf32>
    %c0_3 = arith.constant 0 : index
    %c0_4 = arith.constant 0 : index
    %2 = vector.load %arg3[%c0_3, %c0_4] : memref<192x128xbf16, #tpu.memory_space<vmem>>, vector<16x32xbf16>
    %c16 = arith.constant 16 : index
    %c0_5 = arith.constant 0 : index
    %3 = vector.load %arg3[%c16, %c0_5] : memref<192x128xbf16, #tpu.memory_space<vmem>>, vector<32x128xbf16>
    %c48 = arith.constant 48 : index
    %c0_6 = arith.constant 0 : index
    %4 = vector.load %arg3[%c48, %c0_6] : memref<192x128xbf16, #tpu.memory_space<vmem>>, vector<128x16xbf16>
    %c48_7 = arith.constant 48 : index
    %c16_8 = arith.constant 16 : index
    %5 = vector.load %arg3[%c48_7, %c16_8] : memref<192x128xbf16, #tpu.memory_space<vmem>>, vector<128x16xbf16>
    %c176 = arith.constant 176 : index
    %c0_9 = arith.constant 0 : index
    %6 = vector.load %arg3[%c176, %c0_9] : memref<192x128xbf16, #tpu.memory_space<vmem>>, vector<16x32xbf16>
    %c176_10 = arith.constant 176 : index
    %c32 = arith.constant 32 : index
    %7 = vector.load %arg3[%c176_10, %c32] : memref<192x128xbf16, #tpu.memory_space<vmem>>, vector<16x32xbf16>
    %c0_11 = arith.constant 0 : index
    %c0_12 = arith.constant 0 : index
    %8 = vector.load %arg4[%c0_11, %c0_12] : memref<8x128xf32, #tpu.memory_space<vmem>>, vector<1x32xf32>
    %c1 = arith.constant 1 : index
    %c0_13 = arith.constant 0 : index
    %9 = vector.load %arg4[%c1, %c0_13] : memref<8x128xf32, #tpu.memory_space<vmem>>, vector<1x16xf32>
    %c1_14 = arith.constant 1 : index
    %c16_15 = arith.constant 16 : index
    %10 = vector.load %arg4[%c1_14, %c16_15] : memref<8x128xf32, #tpu.memory_space<vmem>>, vector<1x16xf32>
    %c2 = arith.constant 2 : index
    %c0_16 = arith.constant 0 : index
    %11 = vector.load %arg4[%c2, %c0_16] : memref<8x128xf32, #tpu.memory_space<vmem>>, vector<1x32xf32>
    %c2_17 = arith.constant 2 : index
    %c32_18 = arith.constant 32 : index
    %12 = vector.load %arg4[%c2_17, %c32_18] : memref<8x128xf32, #tpu.memory_space<vmem>>, vector<1x32xf32>
    %13 = arith.truncf %1 : vector<8x16xf32> to vector<8x16xbf16>
    %cst = arith.constant dense<0.000000e+00> : vector<8x32xf32>
    %14 = tpu.matmul %13, %2, %cst {dimension_numbers = #tpu.dot_dimension_numbers<[1], [0], [0], [1], [0, 0, 1, 1], [], []>} : vector<8x16xbf16>, vector<16x32xbf16>, vector<8x32xf32> -> vector<8x32xf32>
    %15 = vector.broadcast %8 : vector<1x32xf32> to vector<8x32xf32>
    %16 = arith.addf %14, %15 : vector<8x32xf32>
    %17 = arith.truncf %16 : vector<8x32xf32> to vector<8x32xbf16>
    %cst_19 = arith.constant dense<0.000000e+00> : vector<8x128xf32>
    %18 = tpu.matmul %17, %3, %cst_19 {dimension_numbers = #tpu.dot_dimension_numbers<[1], [0], [0], [1], [0, 0, 1, 1], [], []>} : vector<8x32xbf16>, vector<32x128xbf16>, vector<8x128xf32> -> vector<8x128xf32>
    %19 = arith.truncf %18 : vector<8x128xf32> to vector<8x128xbf16>
    %cst_20 = arith.constant dense<0.000000e+00> : vector<8x16xf32>
    %20 = tpu.matmul %19, %4, %cst_20 {dimension_numbers = #tpu.dot_dimension_numbers<[1], [0], [0], [1], [0, 0, 1, 1], [], []>} : vector<8x128xbf16>, vector<128x16xbf16>, vector<8x16xf32> -> vector<8x16xf32>
    %21 = vector.broadcast %9 : vector<1x16xf32> to vector<8x16xf32>
    %22 = arith.addf %20, %21 : vector<8x16xf32>
    %23 = arith.truncf %18 : vector<8x128xf32> to vector<8x128xbf16>
    %cst_21 = arith.constant dense<0.000000e+00> : vector<8x16xf32>
    %24 = tpu.matmul %23, %5, %cst_21 {dimension_numbers = #tpu.dot_dimension_numbers<[1], [0], [0], [1], [0, 0, 1, 1], [], []>} : vector<8x128xbf16>, vector<128x16xbf16>, vector<8x16xf32> -> vector<8x16xf32>
    %25 = vector.broadcast %10 : vector<1x16xf32> to vector<8x16xf32>
    %26 = arith.addf %24, %25 : vector<8x16xf32>
    %27 = math.tanh %22 : vector<8x16xf32>
    %28 = arith.negf %26 : vector<8x16xf32>
    %29 = math.exp %28 : vector<8x16xf32>
    %cst_22 = arith.constant 1.000000e+00 : f32
    %30 = vector.broadcast %cst_22 : f32 to vector<8x16xf32>
    %31 = arith.addf %30, %29 : vector<8x16xf32>
    %32 = arith.divf %30, %31 : vector<8x16xf32>
    %33 = arith.mulf %27, %32 : vector<8x16xf32>
    %34 = arith.truncf %33 : vector<8x16xf32> to vector<8x16xbf16>
    %cst_23 = arith.constant dense<0.000000e+00> : vector<8x32xf32>
    %35 = tpu.matmul %34, %6, %cst_23 {dimension_numbers = #tpu.dot_dimension_numbers<[1], [0], [0], [1], [0, 0, 1, 1], [], []>} : vector<8x16xbf16>, vector<16x32xbf16>, vector<8x32xf32> -> vector<8x32xf32>
    %36 = vector.broadcast %11 : vector<1x32xf32> to vector<8x32xf32>
    %37 = arith.addf %35, %36 : vector<8x32xf32>
    %cst_24 = arith.constant 0.000000e+00 : f32
    %38 = vector.broadcast %cst_24 : f32 to vector<8x32xf32>
    %39 = arith.cmpf oge, %37, %38 : vector<8x32xf32>
    %cst_25 = arith.constant 4.000000e-01 : f32
    %40 = vector.broadcast %cst_25 : f32 to vector<8x32xf32>
    %41 = arith.mulf %40, %37 : vector<8x32xf32>
    %42 = arith.select %39, %37, %41 : vector<8x32xi1>, vector<8x32xf32>
    %43 = arith.truncf %33 : vector<8x16xf32> to vector<8x16xbf16>
    %cst_26 = arith.constant dense<0.000000e+00> : vector<8x32xf32>
    %44 = tpu.matmul %43, %7, %cst_26 {dimension_numbers = #tpu.dot_dimension_numbers<[1], [0], [0], [1], [0, 0, 1, 1], [], []>} : vector<8x16xbf16>, vector<16x32xbf16>, vector<8x32xf32> -> vector<8x32xf32>
    %45 = vector.broadcast %12 : vector<1x32xf32> to vector<8x32xf32>
    %46 = arith.addf %44, %45 : vector<8x32xf32>
    %cst_27 = arith.constant 0.000000e+00 : f32
    %47 = vector.broadcast %cst_27 : f32 to vector<8x32xf32>
    %48 = arith.cmpf oge, %46, %47 : vector<8x32xf32>
    %cst_28 = arith.constant 4.000000e-01 : f32
    %49 = vector.broadcast %cst_28 : f32 to vector<8x32xf32>
    %50 = arith.mulf %49, %46 : vector<8x32xf32>
    %51 = arith.select %48, %46, %50 : vector<8x32xi1>, vector<8x32xf32>
    %52 = arith.addf %0, %42 : vector<8x32xf32>
    %cst_29 = arith.constant 0.707106769 : f32
    %53 = vector.broadcast %cst_29 : f32 to vector<8x32xf32>
    %54 = arith.mulf %52, %53 : vector<8x32xf32>
    %c0_30 = arith.constant 0 : index
    %c0_31 = arith.constant 0 : index
    %55 = vector.load %arg5[%c0_30, %c0_31] : memref<8x64xf32, #tpu.memory_space<vmem>>, vector<8x32xf32>
    tpu.vector_store %arg5[%c0_30, %c0_31], %54 {strides = array<i32>} : memref<8x64xf32, #tpu.memory_space<vmem>>, vector<8x32xf32>,
    %c0_32 = arith.constant 0 : index
    %c32_33 = arith.constant 32 : index
    %56 = vector.load %arg5[%c0_32, %c32_33] : memref<8x64xf32, #tpu.memory_space<vmem>>, vector<8x32xf32>
    tpu.vector_store %arg5[%c0_32, %c32_33], %51 {strides = array<i32>} : memref<8x64xf32, #tpu.memory_space<vmem>>, vector<8x32xf32>,
    return
  }
  func.func @transform_0(%arg0: i32) -> (i32, i32) {
    %c0_i32 = arith.constant 0 : i32
    %c0_i32_0 = arith.constant 0 : i32
    return %arg0, %c0_i32 : i32, i32
  }
  func.func @transform_1(%arg0: i32) -> (i32, i32) {
    %c0_i32 = arith.constant 0 : i32
    %c0_i32_0 = arith.constant 0 : i32
    return %arg0, %c0_i32 : i32, i32
  }
  func.func @transform_2(%arg0: i32) -> (i32, i32) {
    %c0_i32 = arith.constant 0 : i32
    %c0_i32_0 = arith.constant 0 : i32
    %c0_i32_1 = arith.constant 0 : i32
    return %c0_i32, %c0_i32_0 : i32, i32
  }
  func.func @transform_3(%arg0: i32) -> (i32, i32) {
    %c0_i32 = arith.constant 0 : i32
    %c0_i32_0 = arith.constant 0 : i32
    %c0_i32_1 = arith.constant 0 : i32
    return %c0_i32, %c0_i32_0 : i32, i32
  }
  func.func @transform_4(%arg0: i32) -> (i32, i32) {
    %c0_i32 = arith.constant 0 : i32
    %c0_i32_0 = arith.constant 0 : i32
    return %arg0, %c0_i32 : i32, i32
  }
}

</mosaic_0001>

<bundles_post_ra>
// kernel: tpu_custom_call.1
= control target key start
LH: loop header
LB: loop body
LE: loop exit
PB: predicated region body
PF: predicated region fallthrough
CT: control target
= control target key end

     0   :  { %9 = vsyncpa [#allocation3], 0  ;;  %s861_s0 = inlined_call_operand.hbm [shape: f32[8,32], index: 0, kind: input, shape index: {}]   ;;  %s862_s1 = inlined_call_operand.hbm [shape: f32[8,16], index: 1, kind: input, shape index: {}]   ;;  %s863_s2 = inlined_call_operand.hbm [shape: bf16[192,128], index: 2, kind: input, shape index: {}]   ;;  %s864_s3 = inlined_call_operand.hbm [shape: f32[8,128], index: 3, kind: input, shape index: {}]   ;;  %s865_s4 = inlined_call_operand.hbm [shape: f32[8,64], index: 4, kind: output, shape index: {}]  }
   0x1   :  { %10 = vsyncpa [#allocation6], 0 }
   0x2   :  { %11 = vsyncpa [#allocation9], 0 }
   0x3   :  { %12 = vsyncpa [#allocation4], 0  ;;  %s762_s15 = smov [#allocation5]   ;;  %s763_s17 = smov [#allocation2]  }
   0x4   :  { %s29_s16 = sshll.u32 %s762_s15, 4  ;;  %s19_s18 = sshll.u32 %s763_s17, 4  ;;  %s30_s16 = int_to_ptr.vmem [resolvable:$true] %s29_s16  ;;  %s20_s18 = int_to_ptr.vmem [resolvable:$true] %s19_s18 }
   0x5   :  { %s662_s19 = scalar_lea.vmem %s30_s16, 128  ;;  %p667_p1 = scmp.lt.s32.totalorder %s30_s16, %s30_s16 }
   0x6   :  { %p663_p0 = scmp.ne.s32.totalorder %s30_s16, %s662_s19  ;;  %p668_p2 = scmp.lt.s32.totalorder %s662_s19, %s662_s19 }
   0x8   :  { %p669_p3 = por %p668_p2, %p667_p1 }
   0xa   :  { %p670_p4 = pnand %p669_p3, %p663_p0 }
   0xc   :  { %673 = shalt.err (!%p670_p4)
}
   0xd   :  { %32 = dma.hbm_to_vmem [thread:$0]  %s862_s1, 128, %s30_s16, [#allocation6]  }
   0xe   :  { %s682_s22 = scalar_lea.vmem %s20_s18, 128  ;;  %p687_p6 = scmp.lt.s32.totalorder %s20_s18, %s20_s18 }
   0xf   :  { %p683_p5 = scmp.ne.s32.totalorder %s20_s18, %s682_s22  ;;  %p688_p7 = scmp.lt.s32.totalorder %s682_s22, %s682_s22 }
  0x11   :  { %p689_p8 = por %p688_p7, %p687_p6 }
  0x13   :  { %p690_p9 = pnand %p689_p8, %p683_p5 }
  0x15   :  { %693 = shalt.err (!%p690_p9)
}
  0x16   :  { %22 = dma.hbm_to_vmem [thread:$0]  %s861_s0, 128, %s20_s18, [#allocation3]  }
  0x17   :  { %s764_s25 = smov [#allocation7]  }
  0x18   :  { %s38_s26 = sshll.u32 %s764_s25, 4  ;;  %s39_s26 = int_to_ptr.vmem [resolvable:$true] %s38_s26 }
  0x19   :  { %s702_s27 = scalar_lea.vmem %s39_s26, 1536  ;;  %p707_p11 = scmp.lt.s32.totalorder %s39_s26, %s39_s26 }
  0x1a   :  { %p703_p10 = scmp.ne.s32.totalorder %s39_s26, %s702_s27  ;;  %p708_p12 = scmp.lt.s32.totalorder %s702_s27, %s702_s27 }
  0x1c   :  { %p709_p13 = por %p708_p12, %p707_p11 }
  0x1e   :  { %p710_p0 = pnand %p709_p13, %p703_p10 }
  0x20   :  { %713 = shalt.err (!%p710_p0)
}
  0x21   :  { %s765_s1 = smov 64   ;;  %s766_s28 = smov 4  }
  0x22   :  { %44 = dma.hbm_to_vmem [thread:$0]  %s863_s2, 1536, %s39_s26, [#allocation6], %s765_s1, %s765_s1, %s766_s28  }
  0x23   :  { %s767_s5 = smov [#allocation8]  }
  0x24   :  { %s51_s6 = sshll.u32 %s767_s5, 4  ;;  %s52_s6 = int_to_ptr.vmem [resolvable:$true] %s51_s6 }
  0x25   :  { %s722_s0 = scalar_lea.vmem %s52_s6, 128  ;;  %p727_p2 = scmp.lt.s32.totalorder %s52_s6, %s52_s6 }
  0x26   :  { %p723_p1 = scmp.ne.s32.totalorder %s52_s6, %s722_s0  ;;  %p728_p3 = scmp.lt.s32.totalorder %s722_s0, %s722_s0 }
  0x28   :  { %p729_p4 = por %p728_p3, %p727_p2 }
  0x2a   :  { %p730_p5 = pnand %p729_p4, %p723_p1 }
  0x2c   :  { %733 = shalt.err (!%p730_p5)
}
  0x2d   :  { %54 = dma.hbm_to_vmem [thread:$0]  %s864_s3, 128, %s52_s6, [#allocation9]  }
  0x2e   :  { %754 = dma.done.wait [#allocation3], 128  }
  0x2f   :  { %755 = vsyncadd [#allocation3], 4294967168 }
  0x30   :  { %756 = dma.done.wait [#allocation6], 1664  }
  0x31   :  { %757 = vsyncadd [#allocation6], 4294965632 }
  0x32   :  { %758 = dma.done.wait [#allocation9], 128  }
  0x33   :  { %759 = vsyncadd [#allocation9], 4294967168  ;;  %v768_v0 = vmov 0.0   ;;  %vm769_vm0 = vmmov 0   ;;  %v636_v1 = vld [vmem:[#allocation7] sm:$0xff]   ;;  %v69_v2 = vld [vmem:[#allocation5] sm:$0xff] }
  0x34   :  { %558 = vmatprep.subr.bf16.mxu0 %v768_v0  ;;  %560 = vmatprep.mubr.msk.bf16.mxu0 %vm769_vm0, %v768_v0  ;;  %v97_v3 = vpack.c.bf16 %v69_v2, %v69_v2  ;;  %vm108_vm1 = vcmask 130048   ;;  %v637_v4 = vld [vmem:[#allocation7 + $0x10] sm:$0xff]   ;;  %v638_v5 = vld [vmem:[#allocation7 + $0x8] sm:$0xff]   ;;  %v641_v7 = vld [vmem:[#allocation7 + $0x40] sm:$0xff]   ;;  %s770_s2 = smov 112   ;;  %vm165_vm2 = vcmask 261120  }
  0x35   :  { %564 = vmatprep.subr.bf16.mxu1 %v768_v0  ;;  %568 = vmatprep.mubr.msk.bf16.mxu1 %vm769_vm0, %v768_v0  ;;  %v639_v6 = vld [vmem:[#allocation7 + $0x50] sm:$0xff]   ;;  %v640_v8 = vld [vmem:[#allocation7 + $0x48] sm:$0xff]   ;;  %v642_v9 = vld [vmem:[#allocation7 + $0x38] sm:$0xff]   ;;  %s771_s3 = smov 96   ;;  %s772_s9 = smov 32   ;;  %vm492_vm5 = vcmask 523520  }
  0x36   :  { %559 = vmatpush3.bf16.msra.mxu0 %v636_v1  ;;  %565 = vmatpush3.bf16.msra.mxu1 %v637_v4  ;;  %v643_v10 = vld [vmem:[#allocation7 + $0x30] sm:$0xff]   ;;  %v644_v11 = vld [vmem:[#allocation7 + $0x28] sm:$0xff]   ;;  %v645_v12 = vld [vmem:[#allocation7 + $0x20] sm:$0xff]   ;;  %s773_s10 = smov [#allocation10]  }
  0x37   :  { %572 = vmatprep.subr.bf16.mxu0 %v768_v0  ;;  %566 = vmatprep.subr.bf16.mxu1 %v768_v0  ;;  %v646_v13 = vld [vmem:[#allocation7 + $0x18] sm:$0xff]   ;;  %v511_v14 = vld [vmem:[#allocation8] ss:$0 sm:$0xff]  ;;  %v517_v29 = vld [vmem:[#allocation8 + $0x1] ss:$0 sm:$0xff]  ;;  %s500_s11 = sshll.u32 %s773_s10, 4  ;;  %s501_s11 = int_to_ptr.vmem [resolvable:$true] %s500_s11 }
  0x38   :  { %316 = vrot.lane.b32.xlu0 %v639_v6, %s770_s2  ;;  %312 = vrot.lane.b32.xlu1 %v641_v7, %s770_s2  ;;  %v647_v30 = vld [vmem:[#allocation7 + $0x58] sm:$0xff]   ;;  %v527_v37 = vld [vmem:[#allocation8 + $0x2] ss:$0 sm:$0xff]  ;;  %v68_v61 = vld [vmem:[#allocation2] sm:$0xff]  ;;  %s734_s12 = scalar_lea.vmem %s501_s11, 128  ;;  %p739_p7 = scmp.lt.s32.totalorder %s501_s11, %s501_s11 }
  0x39   :  { %561 = vmatmul.mubr.msk.bf16.vlgmr.msra.gmra.mxu0 %vm108_vm1, %v97_v3  ;;  %p735_p6 = scmp.ne.s32.totalorder %s501_s11, %s734_s12  ;;  %p740_p8 = scmp.lt.s32.totalorder %s734_s12, %s734_s12 }
  0x3a   :  { %588 = vmatprep.mubr.msk.bf16.mxu0 %vm769_vm0, %v768_v0  ;;  %567 = vmatpush3.bf16.msra.mxu1 %v638_v5 }
  0x3b   :  { %592 = vmatprep.subr.bf16.mxu1 %v768_v0  ;;  %573 = vmatpush3.bf16.msra.mxu0 %v639_v6  ;;  %p741_p9 = por %p740_p8, %p739_p7 }
  0x3c   :  { %574 = vmatprep.subr.bf16.mxu0 %v768_v0  ;;  %314 = vrot.lane.b32.xlu0 %v640_v8, %s770_s2 }
  0x3d   :  { %310 = vrot.lane.b32.xlu1 %v642_v9, %s770_s2  ;;  %p742_p10 = pnand %p741_p9, %p735_p6 }
  0x3f   :  { %575 = vmatpush3.bf16.msra.mxu0 %v640_v8 }
  0x40   :  { %576 = vmatprep.subr.bf16.mxu0 %v768_v0  ;;  %308 = vrot.lane.b32.xlu0 %v643_v10, %s770_s2 }
  0x41   :  { %306 = vrot.lane.b32.xlu1 %v644_v11, %s770_s2 }
  0x43   :  { %577 = vmatpush3.bf16.msra.mxu0 %v641_v7 }
  0x44   :  { %578 = vmatprep.subr.bf16.mxu0 %v768_v0  ;;  %304 = vrot.lane.b32.xlu0 %v645_v12, %s770_s2 }
  0x45   :  { %302 = vrot.lane.b32.xlu1 %v646_v13, %s770_s2 }
  0x47   :  { %579 = vmatpush3.bf16.msra.mxu0 %v642_v9 }
  0x48   :  { %580 = vmatprep.subr.bf16.mxu0 %v768_v0  ;;  %327 = vrot.lane.b32.xlu0 %v517_v29, %s770_s2 }
  0x49   :  { %435 = vrot.lane.b32.xlu1 %v647_v30, %s771_s3 }
  0x4b   :  { %581 = vmatpush3.bf16.msra.mxu0 %v643_v10 }
  0x4c   :  { %582 = vmatprep.subr.bf16.mxu0 %v768_v0  ;;  %439 = vrot.lane.b32.xlu0 %v527_v37, %s771_s3 }
  0x4f   :  { %583 = vmatpush3.bf16.msra.mxu0 %v644_v11 }
  0x50   :  { %584 = vmatprep.subr.bf16.mxu0 %v768_v0 }
  0x53   :  { %585 = vmatpush3.bf16.msra.mxu0 %v645_v12 }
  0x54   :  { %586 = vmatprep.subr.bf16.mxu0 %v768_v0 }
  0x57   :  { %587 = vmatpush3.bf16.msra.mxu0 %v646_v13 }
  0x58   :  { %612 = vmatprep.subr.bf16.mxu0 %v768_v0 }
  0xaa   :  { %v317_v17 = vpop.permute.xlu0 %316  ;;  %v313_v23 = vpop.permute.xlu1 %312 }
  0xae   :  { %v315_v22 = vpop.permute.xlu0 %314 }
  0xaf   :  { %v311_v24 = vpop.permute.xlu1 %310 }
  0xb2   :  { %v309_v25 = vpop.permute.xlu0 %308 }
  0xb3   :  { %v307_v26 = vpop.permute.xlu1 %306 }
  0xb6   :  { %v305_v27 = vpop.permute.xlu0 %304 }
  0xb7   :  { %v303_v28 = vpop.permute.xlu1 %302 }
  0xba   :  { %v328_v38 = vpop.permute.xlu0 %327 }
  0xbb   :  { %v436_v36 = vpop.permute.xlu1 %435 }
  0xbe   :  { %v440_v56 = vpop.permute.xlu0 %439 }
  0xf9   :  { %v146_v15 = vpop.f32.mrf.mxu0 }
  0xfa   :  { %v147_v16 = vadd.f32 %v511_v14, %v146_v15 }
  0xfb   :  { %v562_v18 = vpop.f32.mrf.mxu0 }
  0xfc   :  { %v152_v19 = vpack.c.bf16 %v147_v16, %v147_v16 }
  0xfd   :  { %v149_v20 = vpop.f32.mrf.mxu0 }
  0xfe   :  { %569 = vmatmul.mubr.msk.bf16.vlgmr.msra.gmra.mxu1 %vm165_vm2, %v152_v19 }
  0xff   :  { %v563_v21 = vpop.f32.mrf.mxu0  ;;  %593 = vmatpush3.bf16.msra.mxu1 %v317_v17  ;;  %608 = vmatprep.mubr.msk.bf16.mxu1 %vm769_vm0, %v768_v0 }
 0x100   :  { %594 = vmatprep.subr.bf16.mxu1 %v768_v0 }
 0x103   :  { %595 = vmatpush3.bf16.msra.mxu1 %v315_v22 }
 0x104   :  { %596 = vmatprep.subr.bf16.mxu1 %v768_v0 }
 0x107   :  { %597 = vmatpush3.bf16.msra.mxu1 %v313_v23 }
 0x108   :  { %598 = vmatprep.subr.bf16.mxu1 %v768_v0 }
 0x10b   :  { %599 = vmatpush3.bf16.msra.mxu1 %v311_v24 }
 0x10c   :  { %600 = vmatprep.subr.bf16.mxu1 %v768_v0 }
 0x10f   :  { %601 = vmatpush3.bf16.msra.mxu1 %v309_v25 }
 0x110   :  { %602 = vmatprep.subr.bf16.mxu1 %v768_v0 }
 0x113   :  { %603 = vmatpush3.bf16.msra.mxu1 %v307_v26 }
 0x114   :  { %604 = vmatprep.subr.bf16.mxu1 %v768_v0 }
 0x117   :  { %605 = vmatpush3.bf16.msra.mxu1 %v305_v27 }
 0x118   :  { %606 = vmatprep.subr.bf16.mxu1 %v768_v0 }
 0x11b   :  { %607 = vmatpush3.bf16.msra.mxu1 %v303_v28 }
 0x11c   :  { %618 = vmatprep.subr.bf16.mxu1 %v768_v0 }
 0x1be   :  { %v203_v31 = vpop.f32.mrf.mxu1 }
 0x1bf   :  { %v209_v32 = vpack.c.bf16 %v203_v31, %v203_v31 }
 0x1c0   :  { %v570_v33 = vpop.f32.mrf.mxu1 }
 0x1c1   :  { %589 = vmatmul.mubr.bf16.vlgmr.msra.gmra.mxu0 %v209_v32  ;;  %609 = vmatmul.mubr.bf16.vlgmr.msra.gmra.mxu1 %v209_v32 }
 0x1c2   :  { %v206_v34 = vpop.f32.mrf.mxu1  ;;  %613 = vmatpush3.bf16.msra.mxu0 %v647_v30  ;;  %614 = vmatprep.mubr.msk.bf16.mxu0 %vm769_vm0, %v768_v0 }
 0x1c3   :  { %620 = vmatprep.mubr.msk.bf16.mxu1 %vm769_vm0, %v768_v0  ;;  %619 = vmatpush3.bf16.msra.mxu1 %v436_v36 }
 0x1c4   :  { %v571_v35 = vpop.f32.mrf.mxu1 }
 0x281   :  { %v296_v39 = vpop.f32.mrf.mxu0  ;;  %v364_v40 = vpop.f32.mrf.mxu1 }
 0x282   :  { %v365_v41 = vadd.f32 %v364_v40, %v328_v38  ;;  %v297_v49 = vadd.f32 %v517_v29, %v296_v39 }
 0x283   :  { %v590_v42 = vpop.f32.mrf.mxu0  ;;  %v610_v43 = vpop.f32.mrf.mxu1 }
 0x284   :  { %v526_v44 = vmul.f32 -1.442695, %v365_v41 }
 0x285   :  { %v299_v45 = vpop.f32.mrf.mxu0  ;;  %v367_v46 = vpop.f32.mrf.mxu1 }
 0x286   :  { %648 = vpow2.f32 %v526_v44 }
 0x287   :  { %v591_v47 = vpop.f32.mrf.mxu0  ;;  %v611_v48 = vpop.f32.mrf.mxu1  ;;  %650 = vtanh.f32 %v297_v49 }
 0x293   :  { %v649_v50 = vpop.eup %648 }
 0x294   :  { %v374_v51 = vadd.f32 1.0, %v649_v50  ;;  %v651_v52 = vpop.eup %650 }
 0x296   :  { %652 = vrcp.f32 %v374_v51 }
 0x2a3   :  { %v653_v53 = vpop.eup %652 }
 0x2a4   :  { %v377_v54 = vmul.f32 %v653_v53, %v651_v52 }
 0x2a6   :  { %v378_v55 = vpack.c.bf16 %v377_v54, %v377_v54 }
 0x2a8   :  { %615 = vmatmul.mubr.msk.bf16.vlgmr.msra.gmra.mxu0 %vm108_vm1, %v378_v55  ;;  %621 = vmatmul.mubr.msk.bf16.vlgmr.msra.gmra.mxu1 %vm108_vm1, %v378_v55 }
 0x368   :  { %v426_v57 = vpop.f32.mrf.mxu0  ;;  %v476_v58 = vpop.f32.mrf.mxu1 }
 0x369   :  { %v427_v59 = vadd.f32 %v527_v37, %v426_v57  ;;  %v477_v60 = vadd.f32 %v476_v58, %v440_v56 }
 0x36a   :  { %v616_v62 = vpop.f32.mrf.mxu0  ;;  %v622_v63 = vpop.f32.mrf.mxu1 }
 0x36b   :  { %vm432_vm3 = vcmp.ge.f32.partialorder %v427_v59, 0.0  ;;  %v433_v0 = vmul.f32 0.4, %v427_v59  ;;  %v483_v1 = vmul.f32 0.4, %v477_v60  ;;  %vm482_vm4 = vcmp.ge.f32.partialorder %v477_v60, 0.0 }
 0x36c   :  { %v429_v2 = vpop.f32.mrf.mxu0  ;;  %v479_v3 = vpop.f32.mrf.mxu1 }
 0x36d   :  { %v434_v4 = vsel %vm432_vm3, %v427_v59, %v433_v0  ;;  %v484_v5 = vsel %vm482_vm4, %v477_v60, %v483_v1 }
 0x36e   :  { %v485_v6 = vadd.f32 %v434_v4, %v68_v61  ;;  %489 = vrot.lane.b32.xlu1 %v484_v5, %s772_s9  ;;  %v617_v7 = vpop.f32.mrf.mxu0  ;;  %v623_v8 = vpop.f32.mrf.mxu1 }
 0x370   :  { %v486_v9 = vmul.f32 0.70710677, %v485_v6 }
 0x372   :  { %487 = vst.msk [vmem:[#allocation10] sm:$0xff] %vm165_vm2, %v486_v9 }
 0x3e0   :  { %v490_v10 = vpop.permute.xlu1 %489 }
 0x3e1   :  { %493 = vst.msk [vmem:[#allocation10] sm:$0xff] %vm492_vm5, %v490_v10 }
 0x3e2   :  { %745 = shalt.err (!%p742_p10)
}
 0x3e3   :  { %503 = dma.vmem_to_hbm [thread:$0]  %s501_s11, 128, %s865_s4, [#allocation4]  }
 0x3e4   :  { %760 = dma.done.wait [#allocation4], 128  }
 0x3e5   :  { %761 = vsyncadd [#allocation4], 4294967168 }
 0x3e6   :  { %507 = vsyncpa [#allocation3], 1 }
 0x3e7   :  { %508 = vsyncpa [#allocation6], 1 }
 0x3e8   :  { %509 = vsyncpa [#allocation9], 1 }
 0x3e9   :  { %510 = vsyncpa [#allocation4], 1 }

</bundles_post_ra>
